<compile_context>
chip_gen: v6e
topology: v6e:2x2x1
jax: 0.10.0
libtpu: 0.0.40
codegen_flags: <defaults>
</compile_context>

<pallas_src>
import jax
import jax.numpy as jnp
from jax.experimental import pallas as pl
from jax.experimental.pallas import tpu as pltpu


def _round_down(v, m):
    return (v // m) * m


def _make_single_pass_kernel(inv_len):
    def kernel(x_ref, o_ref):
        # x_ref: (Rt, L) native dtype ; o_ref: (1, Rt) output dtype, lane-dense.
        s = jnp.sum(x_ref[...].astype(jnp.float32), axis=-1)        # (Rt,) f32
        o_ref[...] = (s * inv_len).astype(o_ref.dtype)[None, :]     # (1, Rt)
    return kernel


def _make_multi_step_kernel(inv_len, seq_len, l_tile, needs_mask):
    # NOTE(correctness): the resident f32 accumulator is only valid because the
    # L axis is the *innermost* grid axis (the output block index changes only
    # after a full reduction pass).  Keep grid=(row_tiles, L_tiles) ordered
    # exactly this way.
    def kernel(x_ref, o_ref, acc_ref):
        li = pl.program_id(1)

        @pl.when(li == 0)
        def _init():
            acc_ref[...] = jnp.zeros_like(acc_ref)

        x = x_ref[...].astype(jnp.float32)                           # (Rt, Lt)
        if needs_mask:
            # Mask out-of-range columns of the padded tail L tile.
            col = li * l_tile + jax.lax.broadcasted_iota(jnp.int32, x.shape, 1)
            x = jnp.where(col < seq_len, x, 0.0)
        acc_ref[...] += jnp.sum(x, axis=-1)[None, :]                 # (1, Rt)

        @pl.when(li == pl.num_programs(1) - 1)
        def _finalize():
            o_ref[...] = (acc_ref[...] * inv_len).astype(o_ref.dtype)
    return kernel


def avg_pool(x, stride=None, padding=0, *, max_block_bytes=4 * 1024 * 1024):
    """x: [N, C, L] -> [N, C] (mean over the last axis).

    Matches AvgPool.forward with the module defaults (padding=0; stride is
    irrelevant because kernel_size == L gives a single output position).
    """
    assert padding == 0, "only padding=0 (the module default) is supported"
    # TODO(synk): AvgPool1d with padding>0 (count_include_pad zeros) not implemented.
    del stride  # kernel_size == L => exactly one window; stride cannot matter.

    N, C, L = x.shape
    R = N * C
    x2 = x.reshape(R, L)                 # contiguous row-major -> free reshape
    itemsize = x.dtype.itemsize
    inv_len = 1.0 / float(L)

    # Minimum legal row tile: 128 (lane-dense output) unless R itself is smaller.
    min_rt = R if R < 128 else 128

    if min_rt * L * itemsize <= max_block_bytes:
        # ---------- Fast path: full L in one block, 1-D grid over row tiles ----------
        if R < 128:
            Rt = R                                        # single full-extent block
        else:
            rows_budget = max(
                128, _round_down(max_block_bytes // (L * itemsize), 128))
            Rt = min(rows_budget, max(128, _round_down(R, 128)))
            if R > 128 and pl.cdiv(R, Rt) < 2:
                # Prefer >= 2 row tiles so both v7x TensorCores get work.
                Rt = max(128, _round_down(R // 2, 128))

        out_flat = pl.pallas_call(
            _make_single_pass_kernel(inv_len),
            out_shape=jax.ShapeDtypeStruct((1, R), x.dtype),
            grid_spec=pltpu.PrefetchScalarGridSpec(
                num_scalar_prefetch=0,
                grid=(pl.cdiv(R, Rt),),
                in_specs=[pl.BlockSpec((Rt, L), lambda r: (r, 0))],
                out_specs=pl.BlockSpec((1, Rt), lambda r: (0, r)),
            ),
            compiler_params=pltpu.CompilerParams(
                dimension_semantics=("parallel",),
                vmem_limit_bytes=32 * 1024 * 1024),
        )(x2)
    else:
        # ---------- Fallback (very large L only): tile the reduction axis ----------
        Rt = R if R < 128 else 128
        Lt = max(128, _round_down(max_block_bytes // (Rt * itemsize), 128))
        Lt = min(Lt, max(128, _round_down(L, 128)))
        needs_mask = (L % Lt) != 0

        out_flat = pl.pallas_call(
            _make_multi_step_kernel(inv_len, L, Lt, needs_mask),
            out_shape=jax.ShapeDtypeStruct((1, R), x.dtype),
            grid_spec=pltpu.PrefetchScalarGridSpec(
                num_scalar_prefetch=0,
                # Reduction axis (L) must stay innermost: output block and
                # accumulator are resident across it.
                grid=(pl.cdiv(R, Rt), pl.cdiv(L, Lt)),
                in_specs=[pl.BlockSpec((Rt, Lt), lambda r, l: (r, l))],
                out_specs=pl.BlockSpec((1, Rt), lambda r, l: (0, r)),
                scratch_shapes=[pltpu.VMEM((1, Rt), jnp.float32)],
            ),
            compiler_params=pltpu.CompilerParams(
                dimension_semantics=("parallel", "arbitrary"),
                vmem_limit_bytes=32 * 1024 * 1024),
        )(x2)

    return out_flat.reshape(N, C)


if __name__ == "__main__":
    key = jax.random.PRNGKey(0)
    k1, k2, k3, k4 = jax.random.split(key, 4)

    # Case 1: small module-like shape (N=2, C=4, L=16), f32.  R=8 < 128 ->
    # single full-extent block, single-pass path.
    x1 = jax.random.normal(k1, (2, 4, 16), dtype=jnp.float32)
    o1 = jax.block_until_ready(avg_pool(x1))
    r1 = jnp.mean(x1, axis=-1)
    assert o1.shape == (2, 4)
    assert jnp.allclose(o1, r1, atol=1e-5, rtol=1e-5), "case 1 mismatch"

    # Case 2: bf16, larger shape -> row fold gives R=2048, two (1024, 640)
    # blocks (single-pass path, 2 parallel row tiles).
    x2 = jax.random.normal(k2, (2, 1024, 640), dtype=jnp.bfloat16)
    o2 = jax.block_until_ready(avg_pool(x2))
    r2 = jnp.mean(x2.astype(jnp.float32), axis=-1).astype(jnp.bfloat16)
    assert o2.shape == (2, 1024) and o2.dtype == jnp.bfloat16
    assert jnp.allclose(o2.astype(jnp.float32), r2.astype(jnp.float32),
                        atol=1e-2, rtol=1e-2), "case 2 mismatch"

    # Case 3: R = 300 (not a multiple of 128) -> exercises the padded/write-
    # masked partial row tile (single-pass path).
    x3 = jax.random.normal(k3, (3, 100, 48), dtype=jnp.float32)
    o3 = jax.block_until_ready(avg_pool(x3))
    r3 = jnp.mean(x3, axis=-1)
    assert o3.shape == (3, 100)
    assert jnp.allclose(o3, r3, atol=1e-5, rtol=1e-5), "case 3 mismatch"

    # Case 4: force the multi-step (tiled-L) fallback with a tiny VMEM budget;
    # L=1000 exercises the masked tail L tile.
    x4 = jax.random.normal(k4, (2, 64, 1000), dtype=jnp.float32)
    o4 = jax.block_until_ready(avg_pool(x4, max_block_bytes=256 * 1024))
    r4 = jnp.mean(x4, axis=-1)
    assert o4.shape == (2, 64)
    assert jnp.allclose(o4, r4, atol=1e-5, rtol=1e-5), "case 4 mismatch"

    print("KERNEL_OK")
</pallas_src>

<mosaic_0001>
module attributes {stable_mosaic.version = 11 : i64} {
  func.func @kernel(%arg0: i32, %arg1: memref<8x16xf32, #tpu.memory_space<vmem>>, %arg2: memref<1x8xf32, #tpu.memory_space<vmem>>) attributes {dimension_semantics = [#tpu.dimension_semantics<parallel>], iteration_bounds = array<i64: 1>, scalar_prefetch = 0 : i64, scratch_operands = 0 : i64, tpu.core_type = #tpu.core_type<tc>, window_params = [{transform_indices = @transform_0, window_bounds = array<i64: 8, 16>}, {transform_indices = @transform_1, window_bounds = array<i64: 1, 8>}]} {
    %c0 = arith.constant 0 : index
    %c0_0 = arith.constant 0 : index
    %0 = vector.load %arg1[%c0, %c0_0] : memref<8x16xf32, #tpu.memory_space<vmem>>, vector<8x16xf32>
    %cst = arith.constant dense<0.000000e+00> : vector<8xf32>
    %1 = vector.multi_reduction <add>, %0, %cst [1] : vector<8x16xf32> to vector<8xf32>
    %cst_1 = arith.constant 6.250000e-02 : f32
    %2 = vector.broadcast %cst_1 : f32 to vector<8xf32>
    %3 = arith.mulf %1, %2 : vector<8xf32>
    %4 = vector.shape_cast %3 : vector<8xf32> to vector<1x8xf32>
    %c0_2 = arith.constant 0 : index
    %c0_3 = arith.constant 0 : index
    %5 = vector.load %arg2[%c0_2, %c0_3] : memref<1x8xf32, #tpu.memory_space<vmem>>, vector<1x8xf32>
    tpu.vector_store %arg2[%c0_2, %c0_3], %4 {strides = array<i32>} : memref<1x8xf32, #tpu.memory_space<vmem>>, vector<1x8xf32>,
    return
  }
  func.func @transform_0(%arg0: i32) -> (i32, i32) {
    %c0_i32 = arith.constant 0 : i32
    %c0_i32_0 = arith.constant 0 : i32
    return %arg0, %c0_i32 : i32, i32
  }
  func.func @transform_1(%arg0: i32) -> (i32, i32) {
    %c0_i32 = arith.constant 0 : i32
    %c0_i32_0 = arith.constant 0 : i32
    return %c0_i32, %arg0 : i32, i32
  }
}

</mosaic_0001>

<bundles_post_ra>
// kernel: tpu_custom_call.1
= control target key start
LH: loop header
LB: loop body
LE: loop exit
PB: predicated region body
PF: predicated region fallthrough
CT: control target
= control target key end

     0   :  { %6 = vsyncpa [#allocation3], 0  ;;  %s116_s0 = inlined_call_operand.hbm [shape: f32[8,16], index: 0, kind: input, shape index: {}]   ;;  %s117_s1 = inlined_call_operand.hbm [shape: f32[1,8], index: 1, kind: output, shape index: {}]  }
   0x1   :  { %7 = vsyncpa [#allocation4], 0  ;;  %s98_s6 = smov [#allocation2]  }
   0x2   :  { %s14_s7 = sshll.u32 %s98_s6, 4  ;;  %s15_s7 = int_to_ptr.vmem [resolvable:$true] %s14_s7 }
   0x3   :  { %s62_s8 = scalar_lea.vmem %s15_s7, 128  ;;  %p67_p1 = scmp.lt.s32.totalorder %s15_s7, %s15_s7 }
   0x4   :  { %p63_p0 = scmp.ne.s32.totalorder %s15_s7, %s62_s8  ;;  %p68_p2 = scmp.lt.s32.totalorder %s62_s8, %s62_s8 }
   0x6   :  { %p69_p3 = por %p68_p2, %p67_p1 }
   0x8   :  { %p70_p4 = pnand %p69_p3, %p63_p0 }
   0xa   :  { %73 = shalt.err (!%p70_p4)
}
   0xb   :  { %17 = dma.hbm_to_vmem [thread:$0]  %s116_s0, 128, %s15_s7, [#allocation3]  }
   0xc   :  { %94 = dma.done.wait [#allocation3], 128  }
   0xd   :  { %95 = vsyncadd [#allocation3], 4294967168  ;;  %vm22_vm0 = vcmask 130048   ;;  %v21_v0 = vld [vmem:[#allocation2] sm:$0xff]  ;;  %v28_v2 = vlaneseq  ;;  %s99_s11 = smov [#allocation5]   ;;  %vm35_vm1 = vcmask 57344  }
   0xe   :  { %v23_v1 = vsel %vm22_vm0, %v21_v0, 0.0  ;;  %s43_s12 = sshll.u32 %s99_s11, 4  ;;  %s44_s12 = int_to_ptr.vmem [resolvable:$true] %s43_s12 }
   0xf   :  { %24 = vadd.xlane.f32.xlu0 %v23_v1  ;;  %v29_v3 = vand.u32 127, %v28_v2  ;;  %v31_v4 = vshrl.u32 %v28_v2, 7  ;;  %s74_s13 = scalar_lea.vmem %s44_s12, 16  ;;  %s78_s0 = scalar_lea.vmem %s44_s12, 32 }
  0x10   :  { %p75_p5 = scmp.ne.s32.totalorder %s44_s12, %s74_s13  ;;  %p79_p6 = scmp.lt.s32.totalorder %s44_s12, %s44_s12 }
  0x11   :  { %v32_v5 = vsub.s32 %v29_v3, %v31_v4  ;;  %p80_p7 = scmp.lt.s32.totalorder %s78_s0, %s74_s13 }
  0x13   :  { %p81_p8 = por %p80_p7, %p79_p6 }
  0x15   :  { %p82_p9 = pnand %p81_p8, %p75_p5 }
  0x98   :  { %v25_v6 = vpop.xlane.xlu0 %24 }
  0x99   :  { %v26_v7 = vmul.f32 0.0625, %v25_v6 }
  0x9b   :  { %v33_v8 = vrot.slane %v26_v7, %v32_v5 }
  0x9d   :  { %36 = vst.msk [vmem:[#allocation5] sm:$0x1] %vm35_vm1, %v33_v8 }
  0x9e   :  { %85 = shalt.err (!%p82_p9)
}
  0x9f   :  { %46 = dma.vmem_to_hbm [thread:$0]  %s44_s12, 16, %s117_s1, [#allocation4]  }
  0xa0   :  { %96 = dma.done.wait [#allocation4], 16  }
  0xa1   :  { %97 = vsyncadd [#allocation4], 4294967280 }
  0xa2   :  { %50 = vsyncpa [#allocation3], 1 }
  0xa3   :  { %51 = vsyncpa [#allocation4], 1 }

</bundles_post_ra>
